<compile_context>
chip_gen: v5e
topology: v5e:2x2
jax: 0.10.0
libtpu: 0.0.40
codegen_flags: <defaults>
</compile_context>

<pallas_src>
import jax
import jax.numpy as jnp
from jax.experimental import pallas as pl
from jax.experimental.pallas import tpu as pltpu


def _rotary_kernel(cos_ref, sin_ref, q_ref, k_ref, qo_ref, ko_ref, cos_sc, sin_sc):
    # cos_ref / sin_ref : (tT, D)        full-width tables  [cos|cos], [sin|-sin]
    # q_ref .. ko_ref   : (1, tT, H, D)  one (batch, seq-tile) block
    # cos_sc / sin_sc   : (tT, H, D)     VMEM caches of the tables broadcast over H
    d = q_ref.shape[-1] // 2

    # Tables change only when the sequence tile (grid axis 0) changes; batch is
    # the innermost grid axis, so refresh the broadcast caches only at b == 0.
    @pl.when(pl.program_id(1) == 0)
    def _():
        cos_sc[...] = jnp.broadcast_to(cos_ref[...][:, None, :], cos_sc.shape)
        sin_sc[...] = jnp.broadcast_to(sin_ref[...][:, None, :], sin_sc.shape)

    cos = cos_sc[...]  # (tT, H, D) broadcasts against (1, tT, H, D) for free
    sin = sin_sc[...]

    q = q_ref[...]
    qo_ref[...] = (q * cos + pltpu.roll(q, shift=d, axis=3) * sin).astype(qo_ref.dtype)
    k = k_ref[...]
    ko_ref[...] = (k * cos + pltpu.roll(k, shift=d, axis=3) * sin).astype(ko_ref.dtype)


def _choose_seq_tile(T, H, D, itemsize, budget_bytes=16 * 1024 * 1024):
    """Pick the sequence-tile length so the resident VMEM set fits the budget.

    16 MiB of resident blocks is safe on every generation (v7x: 64 MiB physical /
    32 MiB default scoped; v5e/v6e: 128 MiB physical) while still giving ~1.5-2 MiB
    per q/k block for realistic (H=16, D=128, bf16) shapes, i.e. past the tile
    size where mem-bound kernels reach ~85% of HBM roofline.
    """
    per_row = (
        4 * 2 * H * D      # q, k, q_out, k_out blocks, double-buffered
        + 2 * H * D        # cos/sin broadcast caches (scratch, single copy)
        + 2 * 2 * D        # cos/sin table blocks, double-buffered
    ) * itemsize
    tT = max(1, budget_bytes // per_row)
    if tT >= T:
        return T
    return max(8, (tT // 8) * 8)  # keep (tT, D) table blocks sublane-aligned


def rotary(q, k, base=10000):
    """Equivalent of Rotary(dim=q.shape[-1]).forward(q, k)."""
    assert q.ndim == 4 and k.shape == q.shape and k.dtype == q.dtype
    B, T, H, D = q.shape
    assert D % 2 == 0
    d = D // 2

    # --- cos/sin cache (tiny, plain JAX glue; mirrors the PyTorch module) ---
    # NOTE: the module computes inv_freq = 1 / base ** arange(0, dim, 2)
    # (no /dim normalization); we keep that semantics, in float math
    # (overflowed powers -> inf -> inv_freq 0 -> cos=1, sin=0).
    exponents = jnp.arange(0, D, 2, dtype=jnp.float32)
    inv_freq = 1.0 / (jnp.float32(base) ** exponents)          # (d,)
    t = jnp.arange(T, dtype=jnp.float32)
    freqs = jnp.outer(t, inv_freq)                              # (T, d)
    cos = jnp.cos(freqs)
    sin = jnp.sin(freqs)
    # Full-width tables: out[:d] = x1*cos + x2*sin ; out[d:] = x2*cos - x1*sin
    cos_full = jnp.concatenate([cos, cos], axis=-1).astype(q.dtype)      # (T, D)
    sin_signed = jnp.concatenate([sin, -sin], axis=-1).astype(q.dtype)   # (T, D)

    itemsize = jnp.dtype(q.dtype).itemsize
    tT = _choose_seq_tile(T, H, D, itemsize)
    num_t = pl.cdiv(T, tT)
    grid = (num_t, B)  # t outer (megacore-parallel), b inner (reuses cached tables)

    qk_spec = pl.BlockSpec((1, tT, H, D), lambda t, b: (b, t, 0, 0))
    cs_spec = pl.BlockSpec((tT, D), lambda t, b: (t, 0))

    out_shape = (
        jax.ShapeDtypeStruct(q.shape, q.dtype),
        jax.ShapeDtypeStruct(k.shape, k.dtype),
    )

    q_out, k_out = pl.pallas_call(
        _rotary_kernel,
        out_shape=out_shape,
        grid_spec=pltpu.PrefetchScalarGridSpec(
            num_scalar_prefetch=0,
            grid=grid,
            in_specs=[cs_spec, cs_spec, qk_spec, qk_spec],
            out_specs=(qk_spec, qk_spec),
            scratch_shapes=[
                pltpu.VMEM((tT, H, D), q.dtype),
                pltpu.VMEM((tT, H, D), q.dtype),
            ],
        ),
        input_output_aliases={2: 0, 3: 1},  # q -> q_out, k -> k_out (in-place RoPE)
        compiler_params=pltpu.CompilerParams(
            # batch axis must be "arbitrary": the scratch caches carry state
            # across it (refreshed only at b == 0).
            dimension_semantics=("parallel", "arbitrary"),
            vmem_limit_bytes=40 * 1024 * 1024,
        ),
    )(cos_full, sin_signed, q, k)
    return q_out, k_out


def _rotary_reference(q, k, base=10000):
    """Plain-JAX mirror of the PyTorch module (slices + concat formulation)."""
    B, T, H, D = q.shape
    d = D // 2
    exponents = jnp.arange(0, D, 2, dtype=jnp.float32)
    inv_freq = 1.0 / (jnp.float32(base) ** exponents)
    t = jnp.arange(T, dtype=jnp.float32)
    freqs = jnp.outer(t, inv_freq)
    cos = jnp.cos(freqs).astype(q.dtype)[None, :, None, :]
    sin = jnp.sin(freqs).astype(q.dtype)[None, :, None, :]

    def apply(x):
        x1, x2 = x[..., :d], x[..., d:]
        y1 = x1 * cos + x2 * sin
        y2 = x1 * (-sin) + x2 * cos
        return jnp.concatenate([y1, y2], axis=-1).astype(x.dtype)

    return apply(q), apply(k)


if __name__ == "__main__":
    key = jax.random.PRNGKey(0)
    kq, kk = jax.random.split(key)
    B, T, H, D = 2, 8, 4, 32  # batch, seq, heads, head_dim (dim=32)
    q = jax.random.normal(kq, (B, T, H, D), dtype=jnp.float32)
    k = jax.random.normal(kk, (B, T, H, D), dtype=jnp.float32)

    # Reference first, so the (aliased) kernel inputs are not needed afterwards.
    q_expected, k_expected = _rotary_reference(q, k)

    q_out, k_out = rotary(q, k)
    jax.block_until_ready((q_out, k_out))

    assert q_out.shape == (B, T, H, D) and k_out.shape == (B, T, H, D)
    assert jnp.allclose(q_out, q_expected, atol=1e-5, rtol=1e-5)
    assert jnp.allclose(k_out, k_expected, atol=1e-5, rtol=1e-5)

    print("KERNEL_OK")
</pallas_src>

<mosaic_0001>
module attributes {stable_mosaic.version = 11 : i64} {
  func.func @_rotary_kernel(%arg0: i32, %arg1: i32, %arg2: memref<8x32xf32, #tpu.memory_space<vmem>>, %arg3: memref<8x32xf32, #tpu.memory_space<vmem>>, %arg4: memref<1x8x4x32xf32, #tpu.memory_space<vmem>>, %arg5: memref<1x8x4x32xf32, #tpu.memory_space<vmem>>, %arg6: memref<1x8x4x32xf32, #tpu.memory_space<vmem>>, %arg7: memref<1x8x4x32xf32, #tpu.memory_space<vmem>>, %arg8: memref<8x4x32xf32, #tpu.memory_space<vmem>>, %arg9: memref<8x4x32xf32, #tpu.memory_space<vmem>>) attributes {dimension_semantics = [#tpu.dimension_semantics<parallel>, #tpu.dimension_semantics<arbitrary>], iteration_bounds = array<i64: 1, 2>, scalar_prefetch = 0 : i64, scratch_operands = 2 : i64, tpu.core_type = #tpu.core_type<tc>, window_params = [{transform_indices = @transform_0, window_bounds = array<i64: 8, 32>}, {transform_indices = @transform_1, window_bounds = array<i64: 8, 32>}, {transform_indices = @transform_2, window_bounds = array<i64: 1, 8, 4, 32>}, {transform_indices = @transform_3, window_bounds = array<i64: 1, 8, 4, 32>}, {transform_indices = @transform_4, window_bounds = array<i64: 1, 8, 4, 32>}, {transform_indices = @transform_5, window_bounds = array<i64: 1, 8, 4, 32>}]} {
    %c0_i32 = arith.constant 0 : i32
    %0 = arith.cmpi eq, %arg1, %c0_i32 : i32
    %1 = arith.extui %0 : i1 to i32
    %c0_i32_0 = arith.constant 0 : i32
    %2 = arith.cmpi ne, %1, %c0_i32_0 : i32
    scf.if %2 {
      %c0_23 = arith.constant 0 : index
      %c0_24 = arith.constant 0 : index
      %21 = vector.load %arg2[%c0_23, %c0_24] : memref<8x32xf32, #tpu.memory_space<vmem>>, vector<8x32xf32>
      %22 = vector.shape_cast %21 : vector<8x32xf32> to vector<8x1x32xf32>
      %23 = vector.shape_cast %22 : vector<8x1x32xf32> to vector<8x1x32xf32>
      %24 = vector.broadcast %23 : vector<8x1x32xf32> to vector<8x4x32xf32>
      %c0_25 = arith.constant 0 : index
      %c0_26 = arith.constant 0 : index
      %c0_27 = arith.constant 0 : index
      %25 = vector.load %arg8[%c0_25, %c0_26, %c0_27] : memref<8x4x32xf32, #tpu.memory_space<vmem>>, vector<8x4x32xf32>
      tpu.vector_store %arg8[%c0_25, %c0_26, %c0_27], %24 {strides = array<i32>} : memref<8x4x32xf32, #tpu.memory_space<vmem>>, vector<8x4x32xf32>,
      %c0_28 = arith.constant 0 : index
      %c0_29 = arith.constant 0 : index
      %26 = vector.load %arg3[%c0_28, %c0_29] : memref<8x32xf32, #tpu.memory_space<vmem>>, vector<8x32xf32>
      %27 = vector.shape_cast %26 : vector<8x32xf32> to vector<8x1x32xf32>
      %28 = vector.shape_cast %27 : vector<8x1x32xf32> to vector<8x1x32xf32>
      %29 = vector.broadcast %28 : vector<8x1x32xf32> to vector<8x4x32xf32>
      %c0_30 = arith.constant 0 : index
      %c0_31 = arith.constant 0 : index
      %c0_32 = arith.constant 0 : index
      %30 = vector.load %arg9[%c0_30, %c0_31, %c0_32] : memref<8x4x32xf32, #tpu.memory_space<vmem>>, vector<8x4x32xf32>
      tpu.vector_store %arg9[%c0_30, %c0_31, %c0_32], %29 {strides = array<i32>} : memref<8x4x32xf32, #tpu.memory_space<vmem>>, vector<8x4x32xf32>,
    } else {
    }
    %c0 = arith.constant 0 : index
    %c0_1 = arith.constant 0 : index
    %c0_2 = arith.constant 0 : index
    %3 = vector.load %arg8[%c0, %c0_1, %c0_2] : memref<8x4x32xf32, #tpu.memory_space<vmem>>, vector<8x4x32xf32>
    %c0_3 = arith.constant 0 : index
    %c0_4 = arith.constant 0 : index
    %c0_5 = arith.constant 0 : index
    %4 = vector.load %arg9[%c0_3, %c0_4, %c0_5] : memref<8x4x32xf32, #tpu.memory_space<vmem>>, vector<8x4x32xf32>
    %c0_6 = arith.constant 0 : index
    %c0_7 = arith.constant 0 : index
    %c0_8 = arith.constant 0 : index
    %c0_9 = arith.constant 0 : index
    %5 = vector.load %arg4[%c0_6, %c0_7, %c0_8, %c0_9] : memref<1x8x4x32xf32, #tpu.memory_space<vmem>>, vector<1x8x4x32xf32>
    %6 = vector.shape_cast %3 : vector<8x4x32xf32> to vector<1x8x4x32xf32>
    %7 = arith.mulf %5, %6 : vector<1x8x4x32xf32>
    %c16_i32 = arith.constant 16 : i32
    %8 = tpu.dynamic_rotate %5 by %c16_i32 dim 3 : vector<1x8x4x32xf32>, i32 -> vector<1x8x4x32xf32>
    %9 = vector.shape_cast %4 : vector<8x4x32xf32> to vector<1x8x4x32xf32>
    %10 = arith.mulf %8, %9 : vector<1x8x4x32xf32>
    %11 = arith.addf %7, %10 : vector<1x8x4x32xf32>
    %c0_10 = arith.constant 0 : index
    %c0_11 = arith.constant 0 : index
    %c0_12 = arith.constant 0 : index
    %c0_13 = arith.constant 0 : index
    %12 = vector.load %arg6[%c0_10, %c0_11, %c0_12, %c0_13] : memref<1x8x4x32xf32, #tpu.memory_space<vmem>>, vector<1x8x4x32xf32>
    tpu.vector_store %arg6[%c0_10, %c0_11, %c0_12, %c0_13], %11 {strides = array<i32>} : memref<1x8x4x32xf32, #tpu.memory_space<vmem>>, vector<1x8x4x32xf32>,
    %c0_14 = arith.constant 0 : index
    %c0_15 = arith.constant 0 : index
    %c0_16 = arith.constant 0 : index
    %c0_17 = arith.constant 0 : index
    %13 = vector.load %arg5[%c0_14, %c0_15, %c0_16, %c0_17] : memref<1x8x4x32xf32, #tpu.memory_space<vmem>>, vector<1x8x4x32xf32>
    %14 = vector.shape_cast %3 : vector<8x4x32xf32> to vector<1x8x4x32xf32>
    %15 = arith.mulf %13, %14 : vector<1x8x4x32xf32>
    %c16_i32_18 = arith.constant 16 : i32
    %16 = tpu.dynamic_rotate %13 by %c16_i32_18 dim 3 : vector<1x8x4x32xf32>, i32 -> vector<1x8x4x32xf32>
    %17 = vector.shape_cast %4 : vector<8x4x32xf32> to vector<1x8x4x32xf32>
    %18 = arith.mulf %16, %17 : vector<1x8x4x32xf32>
    %19 = arith.addf %15, %18 : vector<1x8x4x32xf32>
    %c0_19 = arith.constant 0 : index
    %c0_20 = arith.constant 0 : index
    %c0_21 = arith.constant 0 : index
    %c0_22 = arith.constant 0 : index
    %20 = vector.load %arg7[%c0_19, %c0_20, %c0_21, %c0_22] : memref<1x8x4x32xf32, #tpu.memory_space<vmem>>, vector<1x8x4x32xf32>
    tpu.vector_store %arg7[%c0_19, %c0_20, %c0_21, %c0_22], %19 {strides = array<i32>} : memref<1x8x4x32xf32, #tpu.memory_space<vmem>>, vector<1x8x4x32xf32>,
    return
  }
  func.func @transform_0(%arg0: i32, %arg1: i32) -> (i32, i32) {
    %c0_i32 = arith.constant 0 : i32
    %c0_i32_0 = arith.constant 0 : i32
    return %arg0, %c0_i32 : i32, i32
  }
  func.func @transform_1(%arg0: i32, %arg1: i32) -> (i32, i32) {
    %c0_i32 = arith.constant 0 : i32
    %c0_i32_0 = arith.constant 0 : i32
    return %arg0, %c0_i32 : i32, i32
  }
  func.func @transform_2(%arg0: i32, %arg1: i32) -> (i32, i32, i32, i32) {
    %c0_i32 = arith.constant 0 : i32
    %c0_i32_0 = arith.constant 0 : i32
    %c0_i32_1 = arith.constant 0 : i32
    return %arg1, %arg0, %c0_i32, %c0_i32_0 : i32, i32, i32, i32
  }
  func.func @transform_3(%arg0: i32, %arg1: i32) -> (i32, i32, i32, i32) {
    %c0_i32 = arith.constant 0 : i32
    %c0_i32_0 = arith.constant 0 : i32
    %c0_i32_1 = arith.constant 0 : i32
    return %arg1, %arg0, %c0_i32, %c0_i32_0 : i32, i32, i32, i32
  }
  func.func @transform_4(%arg0: i32, %arg1: i32) -> (i32, i32, i32, i32) {
    %c0_i32 = arith.constant 0 : i32
    %c0_i32_0 = arith.constant 0 : i32
    %c0_i32_1 = arith.constant 0 : i32
    return %arg1, %arg0, %c0_i32, %c0_i32_0 : i32, i32, i32, i32
  }
  func.func @transform_5(%arg0: i32, %arg1: i32) -> (i32, i32, i32, i32) {
    %c0_i32 = arith.constant 0 : i32
    %c0_i32_0 = arith.constant 0 : i32
    %c0_i32_1 = arith.constant 0 : i32
    return %arg1, %arg0, %c0_i32, %c0_i32_0 : i32, i32, i32, i32
  }
}

</mosaic_0001>

<bundles_post_ra>
// kernel: tpu_custom_call.1
= control target key start
LH: loop header
LB: loop body
LE: loop exit
PB: predicated region body
PF: predicated region fallthrough
CT: control target
= control target key end

     0   :  { %s1706_s0 = inlined_call_operand.vmem [shape: f32[8,32], index: 0, kind: input, shape index: {}]   ;;  %s1707_s1 = inlined_call_operand.vmem [shape: f32[8,32], index: 1, kind: input, shape index: {}]   ;;  %s1708_s2 = inlined_call_operand.hbm [shape: f32[2,8,4,32], index: 2, kind: input, shape index: {}, may-alias: {2,4}]   ;;  %s1709_s3 = inlined_call_operand.hbm [shape: f32[2,8,4,32], index: 3, kind: input, shape index: {}, may-alias: {3,5}]   ;;  %s1710_s4 = inlined_call_operand.hbm [shape: f32[2,8,4,32], index: 4, kind: output, shape index: {0}, may-alias: {2,4}]   ;;  %s1711_s5 = inlined_call_operand.hbm [shape: f32[2,8,4,32], index: 5, kind: output, shape index: {1}, may-alias: {3,5}]  }
   0x1   :  { %1714 = sst [smem:[#allocation18_spill]] %s1708_s2 }
   0x2   :  { %11 = vsyncpa [#allocation5], 0 }
   0x3   :  { %13 = vsyncpa [#allocation5 + $0x1], 0 }
   0x4   :  { %14 = vsyncpa [#allocation8], 0 }
   0x5   :  { %16 = vsyncpa [#allocation8 + $0x1], 0 }
   0x6   :  { %17 = vsyncpa [#allocation6], 0 }
   0x7   :  { %19 = vsyncpa [#allocation6 + $0x1], 0 }
   0x8   :  { %20 = vsyncpa [#allocation11], 0 }
   0x9   :  { %22 = vsyncpa [#allocation11 + $0x1], 0  ;;  %s1268_s18 = smov 0   ;;  %s1270_s19 = smov 0  }
   0xa   :  { %s1272_s20 = smov 0   ;;  %s1274_s21 = smov 0  }
   0xb   :  { %s1276_s22 = smov 0   ;;  %s1278_s23 = smov 0  }
   0xc LB: > { %1715 = sst [smem:[#allocation16_spill]] %s1225_s22  ;;  %s942_s24 = sadd.s32 4294967295, %s1229_s23   ;;  %s1229_s23 = sphi %s1278_s23, %s28_s23   ;;  %s1225_s22 = sphi %s1276_s22, %s1724_s22   ;;  %s1221_s21 = sphi %s1274_s21, %s1723_s21   ;;  %s1217_s20 = sphi %s1272_s20, %s1727_s20   ;;  %s1213_s19 = sphi %s1270_s19, %s1726_s19   ;;  %s1209_s18 = sphi %s1268_s18, %s1725_s18  }
   0xd   : > { %s943_s25 = sadd.s32 4294967294, %s1229_s23   ;;  %s37_s26 = sadd.s32 1, %s1225_s22 }
   0xe   : > { %s101_s27 = sadd.s32 1, %s1217_s20  ;;  %p38_p0 = scmp.ge.s32.totalorder %s37_s26, 2 }
   0xf   : > { %p108_p1 = scmp.ne.s32.totalorder %s1217_s20, %s1213_s19  ;;  %p109_p2 = scmp.eq.s32.totalorder %s1229_s23, 0 }
  0x10   : > { %p114_p3 = scmp.ne.s32.totalorder %s1213_s19, %s1209_s18  ;;  %s1729_s26 = smov (%p38_p0, %s37_s26), 0 }
  0x11   : > { %1716 = sst [smem:[#allocation17_spill]] %s1729_s26  ;;  %p1309_p4 = por %p109_p2, %p108_p1 }
  0x12   : > { %p115_p5 = scmp.eq.s32.totalorder %s942_s24, 0  ;;  %s96_s29 = ssub.s32 %s1225_s22, %s1729_s26 }
  0x13   : > { %p168_p6 = scmp.eq.s32.totalorder %s942_s24, 1  ;;  %p99_p7 = scmp.eq.s32.totalorder %s96_s29, 0 }
  0x14   : > { %p1315_p8 = por %p115_p5, %p114_p3  ;;  %p174_p10 = scmp.eq.s32.totalorder %s943_s25, 1 }
  0x15   : > { %p1319_p9 = por %p168_p6, %p108_p1  ;;  %p947_p12 = scmp.ge.s32.totalorder %s1229_s23, 2 }
  0x16   : > { %s1324_s7 = scalar_select %p99_p7, %s1217_s20, %s101_s27  }
  0x17   : > { %p1326_p11 = por %p174_p10, %p114_p3  ;;  %p994_p13 = scmp.lt.s32.totalorder %s1229_s23, 2 }
  0x18   : > { %s1333_s9 = sand.u32 1, %s1217_s20   ;;  %s968_s11 = sshll.u32 %s1225_s22, 5 }
  0x19   : > { %s948_s10 = sshll.u32 %s1333_s9, 5  ;;  %s1721_s2 = sld [smem:[#allocation18_spill]] }
  0x1a   : > { %s240_s15 = scalar_lea.vmem [#allocation4], %s948_s10  ;;  %p1342_p0 = pnand %p994_p13, %p1309_p4 }
  0x1b   : > { %s250_s16 = sshll.u32 %s240_s15, 4  ;;  %p954_p1 = scmp.ge.s32.totalorder %s1229_s23, 1  ;;  %s251_s16 = int_to_ptr.vmem [resolvable:$true] %s250_s16 }
  0x1c   : > { %s237_s25 = scalar_lea.sflag [#allocation5], %s1333_s9  ;;  %s1231_s27 = smov 64  }
  0x1d   : > { %s1232_s29 = smov 4   ;;  %p282_p2 = scmp.lt.s32.totalorder %s1229_s23, 3 }
  0x1e   : > { %s264_s28 = scalar_lea.vmem [#allocation7], %s948_s10  ;;  %s261_s26 = scalar_lea.sflag [#allocation8], %s1333_s9 }
  0x1f   : > { %s247_s14 = scalar_lea.hbm %s1721_s2, %s968_s11  ;;  %p283_p3 = pnand %p954_p1, %p282_p2 }
  0x20   : > { %s248_s17 = sshll.u32 %s247_s14, 4  ;;  %s271_s14 = scalar_lea.hbm %s1709_s3, %s968_s11  ;;  %s249_s17 = int_to_ptr.hbm [resolvable:$true] %s248_s17 }
  0x21   : > { %983 = dma.hbm_to_vmem [thread:$0]  (!%p1342_p0), %s249_s17, 512, %s251_s16, %s237_s25, %s1231_s27, %s1231_s27, %s1232_s29  }
  0x22   : > { %s272_s15 = sshll.u32 %s271_s14, 4  ;;  %s274_s2 = sshll.u32 %s264_s28, 4  ;;  %s273_s15 = int_to_ptr.hbm [resolvable:$true] %s272_s15  ;;  %s275_s2 = int_to_ptr.vmem [resolvable:$true] %s274_s2 }
  0x23   : > { %986 = dma.hbm_to_vmem [thread:$0]  (!%p1342_p0), %s273_s15, 512, %s275_s2, %s261_s26, %s1231_s27, %s1231_s27, %s1232_s29  }
  0x24   : > { %286 = sbr.rel (%p283_p3) target bundleno = 485 (0x1e5), region = 36  ;;  %s1358_s22 = sand.u32 (!%p283_p3), 1, %s1213_s19  }
  0x25   : > { %s955_s16 = sshll.u32 (!%p283_p3), %s1358_s22, 5  ;;  %s289_s17 = scalar_lea.sflag (!%p283_p3), [#allocation5], %s1358_s22 }
  0x26   : > { %s1362_s25 = scalar_lea.vmem (!%p283_p3), [#allocation4], %s955_s16 }
  0x29   : > { %1192 = dma.done.wait (%p1315_p8), %s289_s17, 512  }
  0x2a   : > { %1194 = vsyncadd (%p1315_p8), %s289_s17, 4294966784  ;;  %s299_s9 = scalar_lea.sflag [#allocation8], %s1358_s22  ;;  %s1369_s2 = scalar_lea.vmem [#allocation7], %s955_s16 }
  0x2b   : > { %1196 = dma.done.wait (%p1315_p8), %s299_s9, 512  }
  0x2c   : > { %1198 = vsyncadd (%p1315_p8), %s299_s9, 4294966784  ;;  %s1375_s26 = scalar_lea.vmem [#allocation9], %s955_s16  ;;  %s1377_s10 = scalar_lea.vmem [#allocation10], %s955_s16 }
  0x2d   : > { %p959_p4 = scmp.ne.s32.totalorder %s1221_s21, 0 }
  0x2f   : > { %363 = sbr.rel (%p959_p4) target bundleno = 72 (0x48), region = 48 }
  0x34   : > { %v364_v0 = vld [vmem:[%s1706_s0] sm:$0xff]  ;;  %vm389_vm0 = vcmask 257024  }
  0x35   : > { %v373_v1 = vperm.slane %v364_v0, 0  ;;  %v366_v2 = vrot.slane %v364_v0, 1  ;;  %v367_v3 = vrot.slane %v364_v0, 2  ;;  %v368_v4 = vrot.slane %v364_v0, 3  ;;  %v398_v8 = vld [vmem:[%s1707_s1] sm:$0xff] }
  0x36   : > { %v369_v5 = vrot.slane %v364_v0, 4  ;;  %v370_v6 = vrot.slane %v364_v0, 5  ;;  %v371_v7 = vrot.slane %v364_v0, 6  ;;  %v372_v12 = vrot.slane %v364_v0, 7 }
  0x37   : > { %390 = vst.msk [vmem:[#allocation2] sm:$0xf] %vm389_vm0, %v373_v1  ;;  %v374_v9 = vperm.slane %v366_v2, 0  ;;  %v375_v10 = vperm.slane %v367_v3, 0  ;;  %v376_v11 = vperm.slane %v368_v4, 0  ;;  %v400_v15 = vrot.slane %v398_v8, 1 }
  0x38   : > { %v377_v13 = vperm.slane %v369_v5, 0  ;;  %v378_v14 = vperm.slane %v370_v6, 0  ;;  %v379_v16 = vperm.slane %v371_v7, 0  ;;  %v401_v17 = vrot.slane %v398_v8, 2 }
  0x39   : > { %391 = vst.msk [vmem:[#allocation2 + $0x4] sm:$0xf] %vm389_vm0, %v374_v9  ;;  %v380_v18 = vperm.slane %v372_v12, 0  ;;  %v402_v19 = vrot.slane %v398_v8, 3  ;;  %v407_v20 = vperm.slane %v398_v8, 0  ;;  %v403_v21 = vrot.slane %v398_v8, 4 }
  0x3a   : > { %392 = vst.msk [vmem:[#allocation2 + $0x8] sm:$0xf] %vm389_vm0, %v375_v10  ;;  %v408_v22 = vperm.slane %v400_v15, 0  ;;  %v404_v23 = vrot.slane %v398_v8, 5  ;;  %v409_v24 = vperm.slane %v401_v17, 0  ;;  %v405_v25 = vrot.slane %v398_v8, 6 }
  0x3b   : > { %393 = vst.msk [vmem:[#allocation2 + $0xc] sm:$0xf] %vm389_vm0, %v376_v11  ;;  %v410_v26 = vperm.slane %v402_v19, 0  ;;  %v406_v27 = vrot.slane %v398_v8, 7  ;;  %v411_v28 = vperm.slane %v403_v21, 0 }
  0x3c   : > { %394 = vst.msk [vmem:[#allocation2 + $0x10] sm:$0xf] %vm389_vm0, %v377_v13  ;;  %v412_v29 = vperm.slane %v404_v23, 0  ;;  %v413_v30 = vperm.slane %v405_v25, 0 }
  0x3d   : > { %395 = vst.msk [vmem:[#allocation2 + $0x14] sm:$0xf] %vm389_vm0, %v378_v14  ;;  %v414_v31 = vperm.slane %v406_v27, 0 }
  0x3e   : > { %396 = vst.msk [vmem:[#allocation2 + $0x18] sm:$0xf] %vm389_vm0, %v379_v16 }
  0x3f   : > { %397 = vst.msk [vmem:[#allocation2 + $0x1c] sm:$0xf] %vm389_vm0, %v380_v18 }
  0x40   : > { %423 = vst.msk [vmem:[#allocation3] sm:$0xf] %vm389_vm0, %v407_v20 }
  0x41   : > { %424 = vst.msk [vmem:[#allocation3 + $0x4] sm:$0xf] %vm389_vm0, %v408_v22 }
  0x42   : > { %425 = vst.msk [vmem:[#allocation3 + $0x8] sm:$0xf] %vm389_vm0, %v409_v24 }
  0x43   : > { %426 = vst.msk [vmem:[#allocation3 + $0xc] sm:$0xf] %vm389_vm0, %v410_v26 }
  0x44   : > { %427 = vst.msk [vmem:[#allocation3 + $0x10] sm:$0xf] %vm389_vm0, %v411_v28 }
  0x45   : > { %428 = vst.msk [vmem:[#allocation3 + $0x14] sm:$0xf] %vm389_vm0, %v412_v29 }
  0x46   : > { %429 = vst.msk [vmem:[#allocation3 + $0x18] sm:$0xf] %vm389_vm0, %v413_v30 }
  0x47   : > { %430 = vst.msk [vmem:[#allocation3 + $0x1c] sm:$0xf] %vm389_vm0, %v414_v31 }
  0x48 PF: > { %v1403_v32 = vld [vmem:[%s1362_s25 + $0x8] sm:$0xf]  ;;  %v1406_v33 = vld [vmem:[%s1362_s25] sm:$0xf]  ;;  %s1233_s29 = smov 32   ;;  %s1234_s12 = smov 16  }
  0x49   : > { %470 = vrot.lane.b32.xlu1 %v1403_v32, %s1233_s29  ;;  %464 = vrot.lane.b32.xlu0 %v1406_v33, %s1233_s29  ;;  %v1413_v34 = vld [vmem:[%s1362_s25 + $0x10] sm:$0xf]  ;;  %v1418_v35 = vld [vmem:[%s1362_s25 + $0xc] sm:$0xf]  ;;  %v441_v46 = vld [vmem:[#allocation3 + $0x8] sm:$0xf] }
  0x4a   : > { %476 = vrot.lane.b32.xlu2 %v1413_v34, %s1233_s29  ;;  %v1421_v36 = vld [vmem:[%s1362_s25 + $0x4] sm:$0xf]  ;;  %v1428_v37 = vld [vmem:[%s1362_s25 + $0x14] sm:$0xf]  ;;  %v1433_v38 = vld [vmem:[%s1362_s25 + $0x18] sm:$0xf] }
  0x4b   : > { %v1436_v39 = vld [vmem:[%s1362_s25 + $0x1c] sm:$0xf]  ;;  %v1443_v40 = vld [vmem:[%s1369_s2 + $0x8] sm:$0xf]  ;;  %v1448_v41 = vld [vmem:[%s1369_s2] sm:$0xf] }
  0x4c   : > { %v1451_v42 = vld [vmem:[%s1369_s2 + $0x4] sm:$0xf]  ;;  %v1458_v43 = vld [vmem:[%s1369_s2 + $0x14] sm:$0xf]  ;;  %v1463_v44 = vld [vmem:[%s1369_s2 + $0xc] sm:$0xf] }
  0x4d   : > { %v1466_v45 = vld [vmem:[%s1369_s2 + $0x10] sm:$0xf]  ;;  %v1474_v47 = vld [vmem:[%s1369_s2 + $0x18] sm:$0xf]  ;;  %v1477_v48 = vld [vmem:[%s1369_s2 + $0x1c] sm:$0xf] }
  0x4e   : > { %v439_v49 = vld [vmem:[#allocation3] sm:$0xf]  ;;  %v440_v50 = vld [vmem:[#allocation3 + $0x4] sm:$0xf]  ;;  %v442_v51 = vld [vmem:[#allocation3 + $0xc] sm:$0xf] }
  0x4f   : > { %v444_v52 = vld [vmem:[#allocation3 + $0x14] sm:$0xf]  ;;  %v443_v53 = vld [vmem:[#allocation3 + $0x10] sm:$0xf]  ;;  %vm463_vm1 = vcmask 1047808   ;;  %s1235_s13 = smov 112  }
  0x50   : > { %v446_v19 = vld [vmem:[#allocation3 + $0x1c] sm:$0xf]  ;;  %v445_v23 = vld [vmem:[#allocation3 + $0x18] sm:$0xf]  ;;  %vm592_vm2 = vcmask 257024   ;;  %s970_s14 = sshll.u32 %s1221_s21, 5 }
  0x51   : > { %473 = vrot.lane.b32.xlu1 %v1418_v35, %s1233_s29  ;;  %467 = vrot.lane.b32.xlu0 %v1421_v36, %s1233_s29  ;;  %s740_s16 = scalar_lea.hbm %s1710_s4, %s970_s14  ;;  %s741_s17 = sshll.u32 %s1375_s26, 4  ;;  %s742_s17 = int_to_ptr.vmem [resolvable:$true] %s741_s17 }
  0x52   : > { %479 = vrot.lane.b32.xlu2 %v1428_v37, %s1233_s29  ;;  %s743_s25 = sshll.u32 %s740_s16, 4  ;;  %s722_s9 = scalar_lea.sflag [#allocation6], %s1358_s22  ;;  %s744_s25 = int_to_ptr.hbm [resolvable:$true] %s743_s25 }
  0x53   : > { %s1125_s2 = sshra.s32 %s744_s25, 4  ;;  %s1126_s2 = int_to_ptr.hbm [resolvable:$true] %s1125_s2 }
  0x54   : > { %s1127_s11 = scalar_lea.hbm %s1126_s2, 32  ;;  %p1132_p8 = scmp.lt.s32.totalorder %s1126_s2, %s1710_s4 }
  0x55   : > { %p1128_p5 = scmp.ne.s32.totalorder %s1126_s2, %s1127_s11 }
  0x57   : > { %p1129_p6 = pnand %p1128_p5, %p1319_p9 }
  0x59   : > { %482 = vrot.lane.b32.xlu0 %v1433_v38, %s1233_s29  ;;  %485 = vrot.lane.b32.xlu1 %v1436_v39, %s1233_s29  ;;  %p1130_p7 = pneg %p1129_p6 }
  0x5a   : > { %623 = vrot.lane.b32.xlu2 %v1443_v40, %s1233_s29 }
  0x61   : > { %617 = vrot.lane.b32.xlu0 %v1448_v41, %s1233_s29  ;;  %620 = vrot.lane.b32.xlu1 %v1451_v42, %s1233_s29 }
  0x62   : > { %632 = vrot.lane.b32.xlu2 %v1458_v43, %s1233_s29 }
  0x69   : > { %626 = vrot.lane.b32.xlu0 %v1463_v44, %s1233_s29  ;;  %629 = vrot.lane.b32.xlu1 %v1466_v45, %s1233_s29 }
  0x6a   : > { %524 = vrot.lane.b32.xlu2 %v441_v46, %s1234_s12 }
  0x71   : > { %635 = vrot.lane.b32.xlu0 %v1474_v47, %s1233_s29  ;;  %638 = vrot.lane.b32.xlu1 %v1477_v48, %s1233_s29 }
  0x79   : > { %520 = vrot.lane.b32.xlu0 %v439_v49, %s1234_s12  ;;  %522 = vrot.lane.b32.xlu1 %v440_v50, %s1234_s12 }
  0x81   : > { %526 = vrot.lane.b32.xlu0 %v442_v51, %s1234_s12  ;;  %530 = vrot.lane.b32.xlu1 %v444_v52, %s1234_s12 }
  0x89   : > { %528 = vrot.lane.b32.xlu0 %v443_v53, %s1234_s12 }
  0xa4   : > { %v477_v54 = vpop.permute.xlu2 %476 }
  0xa5   : > { %v478_v1 = vsel %vm463_vm1, %v477_v54, %v1413_v34 }
  0xac   : > { %v480_v59 = vpop.permute.xlu2 %479 }
  0xad   : > { %v481_v62 = vsel %vm463_vm1, %v480_v59, %v1428_v37 }
  0xb4   : > { %v624_v5 = vpop.permute.xlu2 %623 }
  0xb5   : > { %v625_v8 = vsel %vm463_vm1, %v624_v5, %v1443_v40 }
  0xbb   : > { %v471_v55 = vpop.permute.xlu1 %470  ;;  %v465_v56 = vpop.permute.xlu0 %464 }
  0xbc   : > { %v466_v57 = vsel %vm463_vm1, %v465_v56, %v1406_v33  ;;  %v472_v58 = vsel %vm463_vm1, %v471_v55, %v1403_v32  ;;  %v633_v11 = vpop.permute.xlu2 %632 }
  0xbd   : > { %488 = vrot.lane.b32.xlu2 %v466_v57, %s1233_s29  ;;  %492 = vrot.lane.b32.xlu1 %v472_v58, %s1233_s29  ;;  %v634_v14 = vsel %vm463_vm1, %v633_v11, %v1458_v43 }
  0xc3   : > { %v474_v60 = vpop.permute.xlu1 %473  ;;  %v468_v61 = vpop.permute.xlu0 %467 }
  0xc4   : > { %v475_v63 = vsel %vm463_vm1, %v474_v60, %v1418_v35  ;;  %v469_v0 = vsel %vm463_vm1, %v468_v61, %v1421_v36  ;;  %v1538_v24 = vpop.permute.xlu2 %524 }
  0xc5   : > { %494 = vrot.lane.b32.xlu2 %v475_v63, %s1233_s29  ;;  %490 = vrot.lane.b32.xlu0 %v469_v0, %s1233_s29 }
  0xc6   : > { %498 = vrot.lane.b32.xlu1 %v481_v62, %s1233_s29 }
  0xcb   : > { %v483_v2 = vpop.permute.xlu0 %482  ;;  %v486_v3 = vpop.permute.xlu1 %485 }
  0xcc   : > { %v484_v4 = vsel %vm463_vm1, %v483_v2, %v1433_v38  ;;  %v487_v6 = vsel %vm463_vm1, %v486_v3, %v1436_v39 }
  0xcd   : > { %500 = vrot.lane.b32.xlu2 %v484_v4, %s1233_s29  ;;  %496 = vrot.lane.b32.xlu0 %v478_v1, %s1233_s29 }
  0xd3   : > { %v618_v7 = vpop.permute.xlu0 %617  ;;  %v621_v9 = vpop.permute.xlu1 %620 }
  0xd4   : > { %v619_v10 = vsel %vm463_vm1, %v618_v7, %v1448_v41  ;;  %v622_v12 = vsel %vm463_vm1, %v621_v9, %v1451_v42 }
  0xd5   : > { %502 = vrot.lane.b32.xlu2 %v487_v6, %s1233_s29  ;;  %641 = vrot.lane.b32.xlu1 %v619_v10, %s1233_s29 }
  0xd6   : > { %645 = vrot.lane.b32.xlu0 %v625_v8, %s1233_s29 }
  0xdb   : > { %v627_v13 = vpop.permute.xlu0 %626  ;;  %v630_v16 = vpop.permute.xlu1 %629 }
  0xdc   : > { %v628_v15 = vsel %vm463_vm1, %v627_v13, %v1463_v44  ;;  %v631_v17 = vsel %vm463_vm1, %v630_v16, %v1466_v45 }
  0xdd   : > { %643 = vrot.lane.b32.xlu2 %v622_v12, %s1233_s29  ;;  %647 = vrot.lane.b32.xlu1 %v628_v15, %s1233_s29 }
  0xde   : > { %651 = vrot.lane.b32.xlu0 %v634_v14, %s1233_s29 }
  0xe3   : > { %v636_v18 = vpop.permute.xlu0 %635  ;;  %v639_v21 = vpop.permute.xlu1 %638 }
  0xe4   : > { %v637_v20 = vsel %vm463_vm1, %v636_v18, %v1474_v47  ;;  %v640_v22 = vsel %vm463_vm1, %v639_v21, %v1477_v48 }
  0xe5   : > { %649 = vrot.lane.b32.xlu2 %v631_v17, %s1233_s29  ;;  %653 = vrot.lane.b32.xlu1 %v637_v20, %s1233_s29 }
  0xe6   : > { %534 = vrot.lane.b32.xlu0 %v446_v19, %s1234_s12 }
  0xeb   : > { %v521_v25 = vpop.permute.xlu0 %520  ;;  %v523_v29 = vpop.permute.xlu1 %522 }
  0xed   : > { %655 = vrot.lane.b32.xlu2 %v640_v22, %s1233_s29 }
  0xf3   : > { %v527_v30 = vpop.permute.xlu0 %526  ;;  %v531_v50 = vpop.permute.xlu1 %530 }
  0xf5   : > { %532 = vrot.lane.b32.xlu2 %v445_v23, %s1234_s12 }
  0xfb   : > { %v529_v52 = vpop.permute.xlu0 %528 }
 0x117   : > { %v489_v26 = vpop.permute.xlu2 %488 }
 0x118   : > { %v504_v27 = vsel %vm463_vm1, %v489_v26, %v1406_v33 }
 0x119   : > { %v544_v28 = vmul.f32 %v521_v25, %v504_v27 }
 0x11b   : > { %560 = vrot.lane.b32.xlu1 %v544_v28, %s1235_s13 }
 0x11f   : > { %v495_v31 = vpop.permute.xlu2 %494 }
 0x120   : > { %v507_v46 = vsel %vm463_vm1, %v495_v31, %v1418_v35 }
 0x121   : > { %v547_v49 = vmul.f32 %v527_v30, %v507_v46 }
 0x123   : > { %566 = vrot.lane.b32.xlu1 %v547_v49, %s1235_s13  ;;  %v431_v49 = vld [vmem:[#allocation2] sm:$0xf] }
 0x127   : > { %v501_v51 = vpop.permute.xlu2 %500 }
 0x128   : > { %v510_v9 = vsel %vm463_vm1, %v501_v51, %v1433_v38 }
 0x12f   : > { %v503_v53 = vpop.permute.xlu2 %502  ;;  %v493_v54 = vpop.permute.xlu1 %492 }
 0x130   : > { %v506_v55 = vsel %vm463_vm1, %v493_v54, %v1403_v32  ;;  %v511_v18 = vsel %vm463_vm1, %v503_v53, %v1436_v39  ;;  %v434_v53 = vld [vmem:[#allocation2 + $0xc] sm:$0xf]  ;;  %v432_v54 = vld [vmem:[#allocation2 + $0x4] sm:$0xf] }
 0x131   : > { %v546_v56 = vmul.f32 %v1538_v24, %v506_v55  ;;  %v458_v55 = vmul.f32 %v1418_v35, %v434_v53  ;;  %v433_v35 = vld [vmem:[#allocation2 + $0x8] sm:$0xf] }
 0x133   : > { %564 = vrot.lane.b32.xlu0 %v546_v56, %s1235_s13 }
 0x137   : > { %v644_v57 = vpop.permute.xlu2 %643  ;;  %v491_v58 = vpop.permute.xlu0 %490 }
 0x138   : > { %v505_v59 = vsel %vm463_vm1, %v491_v58, %v1421_v36  ;;  %v499_v60 = vpop.permute.xlu1 %498  ;;  %v658_v16 = vsel %vm463_vm1, %v644_v57, %v1451_v42 }
 0x139   : > { %v545_v61 = vmul.f32 %v523_v29, %v505_v59  ;;  %v509_v62 = vsel %vm463_vm1, %v499_v60, %v1428_v37  ;;  %v666_v19 = vmul.f32 %v658_v16, %v523_v29  ;;  %v1595_v60 = vld [vmem:[#allocation2 + $0x10] sm:$0xf] }
 0x13a   : > { %v549_v63 = vmul.f32 %v531_v50, %v509_v62 }
 0x13b   : > { %562 = vrot.lane.b32.xlu2 %v545_v61, %s1235_s13 }
 0x13c   : > { %570 = vrot.lane.b32.xlu0 %v549_v63, %s1235_s13 }
 0x13f   : > { %v650_v0 = vpop.permute.xlu2 %649  ;;  %v497_v1 = vpop.permute.xlu0 %496 }
 0x140   : > { %v508_v2 = vsel %vm463_vm1, %v497_v1, %v1413_v34  ;;  %v436_v1 = vld [vmem:[#allocation2 + $0x14] sm:$0xf] }
 0x141   : > { %v548_v3 = vmul.f32 %v529_v52, %v508_v2  ;;  %v460_v2 = vmul.f32 %v1428_v37, %v436_v1 }
 0x143   : > { %568 = vrot.lane.b32.xlu2 %v548_v3, %s1235_s13 }
 0x147   : > { %v656_v4 = vpop.permute.xlu2 %655  ;;  %v642_v5 = vpop.permute.xlu1 %641 }
 0x148   : > { %v657_v6 = vsel %vm463_vm1, %v642_v5, %v1448_v41  ;;  %v646_v7 = vpop.permute.xlu0 %645 }
 0x149   : > { %v665_v8 = vmul.f32 %v657_v6, %v521_v25  ;;  %v661_v25 = vsel %vm463_vm1, %v650_v0, %v1466_v45  ;;  %v659_v26 = vsel %vm463_vm1, %v646_v7, %v1443_v40  ;;  %v611_v7 = vmul.f32 %v1443_v40, %v433_v35 }
 0x14a   : > { %v669_v27 = vmul.f32 %v661_v25, %v529_v52  ;;  %v667_v28 = vmul.f32 %v659_v26, %v1538_v24  ;;  %v455_v24 = vmul.f32 %v1406_v33, %v431_v49  ;;  %v459_v33 = vmul.f32 %v1413_v34, %v1595_v60  ;;  %v438_v34 = vld [vmem:[#allocation2 + $0x1c] sm:$0xf] }
 0x14b   : > { %681 = vrot.lane.b32.xlu0 %v665_v8, %s1235_s13  ;;  %v462_v5 = vmul.f32 %v1436_v39, %v438_v34  ;;  %v609_v8 = vmul.f32 %v1448_v41, %v431_v49  ;;  %v614_v40 = vmul.f32 %v1458_v43, %v436_v1  ;;  %v612_v41 = vmul.f32 %v1463_v44, %v434_v53 }
 0x14f   : > { %v533_v10 = vpop.permute.xlu2 %532  ;;  %v648_v11 = vpop.permute.xlu1 %647 }
 0x150   : > { %v550_v12 = vmul.f32 %v533_v10, %v510_v9  ;;  %v660_v13 = vsel %vm463_vm1, %v648_v11, %v1463_v44  ;;  %v652_v14 = vpop.permute.xlu0 %651 }
 0x151   : > { %v668_v15 = vmul.f32 %v660_v13, %v527_v30  ;;  %v662_v29 = vsel %vm463_vm1, %v652_v14, %v1458_v43  ;;  %v664_v30 = vsel %vm463_vm1, %v656_v4, %v1477_v48 }
 0x152   : > { %572 = vrot.lane.b32.xlu1 %v550_v12, %s1235_s13  ;;  %v670_v46 = vmul.f32 %v662_v29, %v531_v50  ;;  %v456_v50 = vmul.f32 %v1421_v36, %v432_v54  ;;  %v457_v36 = vmul.f32 %v1403_v32, %v433_v35  ;;  %v437_v12 = vld [vmem:[#allocation2 + $0x18] sm:$0xf] }
 0x153   : > { %687 = vrot.lane.b32.xlu0 %v668_v15, %s1235_s13  ;;  %v461_v39 = vmul.f32 %v1433_v38, %v437_v12  ;;  %v610_v38 = vmul.f32 %v1451_v42, %v432_v54  ;;  %v615_v43 = vmul.f32 %v1474_v47, %v437_v12 }
 0x157   : > { %v654_v17 = vpop.permute.xlu1 %653 }
 0x158   : > { %v663_v20 = vsel %vm463_vm1, %v654_v17, %v1474_v47  ;;  %v535_v21 = vpop.permute.xlu0 %534 }
 0x159   : > { %v671_v22 = vmul.f32 %v663_v20, %v533_v10  ;;  %v551_v23 = vmul.f32 %v535_v21, %v511_v18  ;;  %v672_v31 = vmul.f32 %v664_v30, %v535_v21 }
 0x15a   : > { %683 = vrot.lane.b32.xlu1 %v666_v19, %s1235_s13 }
 0x15b   : > { %574 = vrot.lane.b32.xlu2 %v551_v23, %s1235_s13  ;;  %693 = vrot.lane.b32.xlu0 %v671_v22, %s1235_s13 }
 0x162   : > { %689 = vrot.lane.b32.xlu1 %v669_v27, %s1235_s13 }
 0x163   : > { %685 = vrot.lane.b32.xlu2 %v667_v28, %s1235_s13 }
 0x16a   : > { %695 = vrot.lane.b32.xlu1 %v672_v31, %s1235_s13 }
 0x16b   : > { %691 = vrot.lane.b32.xlu2 %v670_v46, %s1235_s13 }
 0x18d   : > { %v561_v51 = vpop.permute.xlu1 %560 }
 0x18e   : > { %v584_v52 = vadd.f32 %v561_v51, %v455_v24 }
 0x190   : > { %593 = vst.msk [vmem:[%s1375_s26] sm:$0xf] %vm592_vm2, %v584_v52 }
 0x195   : > { %v567_v56 = vpop.permute.xlu1 %566  ;;  %v563_v57 = vpop.permute.xlu2 %562 }
 0x196   : > { %v587_v58 = vadd.f32 %v567_v56, %v458_v55  ;;  %v585_v59 = vadd.f32 %v563_v57, %v456_v50 }
 0x198   : > { %596 = vst.msk [vmem:[%s1375_s26 + $0xc] sm:$0xf] %vm592_vm2, %v587_v58 }
 0x199   : > { %594 = vst.msk [vmem:[%s1375_s26 + $0x4] sm:$0xf] %vm592_vm2, %v585_v59 }
 0x19d   : > { %v569_v61 = vpop.permute.xlu2 %568 }
 0x19e   : > { %v588_v62 = vadd.f32 %v569_v61, %v459_v33 }
 0x1a0   : > { %597 = vst.msk [vmem:[%s1375_s26 + $0x10] sm:$0xf] %vm592_vm2, %v588_v62 }
 0x1a5   : > { %v565_v63 = vpop.permute.xlu0 %564 }
 0x1a6   : > { %v586_v0 = vadd.f32 %v565_v63, %v457_v36 }
 0x1a8   : > { %595 = vst.msk [vmem:[%s1375_s26 + $0x8] sm:$0xf] %vm592_vm2, %v586_v0 }
 0x1ae   : > { %v571_v3 = vpop.permute.xlu0 %570 }
 0x1af   : > { %v589_v4 = vadd.f32 %v571_v3, %v460_v2 }
 0x1b1   : > { %598 = vst.msk [vmem:[%s1375_s26 + $0x14] sm:$0xf] %vm592_vm2, %v589_v4 }
 0x1b5   : > { %v575_v6 = vpop.permute.xlu2 %574 }
 0x1b6   : > { %v591_v32 = vadd.f32 %v575_v6, %v462_v5 }
 0x1b8   : > { %600 = vst.msk [vmem:[%s1375_s26 + $0x1c] sm:$0xf] %vm592_vm2, %v591_v32 }
 0x1bd   : > { %v686_v37 = vpop.permute.xlu2 %685  ;;  %v682_v9 = vpop.permute.xlu0 %681 }
 0x1be   : > { %v707_v10 = vadd.f32 %v686_v37, %v611_v7  ;;  %v705_v11 = vadd.f32 %v682_v9, %v609_v8 }
 0x1c0   : > { %715 = vst.msk [vmem:[%s1377_s10 + $0x8] sm:$0xf] %vm592_vm2, %v707_v10 }
 0x1c1   : > { %713 = vst.msk [vmem:[%s1377_s10] sm:$0xf] %vm592_vm2, %v705_v11 }
 0x1c4   : > { %v573_v13 = vpop.permute.xlu1 %572 }
 0x1c5   : > { %v590_v14 = vadd.f32 %v573_v13, %v461_v39  ;;  %v692_v15 = vpop.permute.xlu2 %691  ;;  %v688_v16 = vpop.permute.xlu0 %687 }
 0x1c6   : > { %v710_v17 = vadd.f32 %v692_v15, %v614_v40  ;;  %v708_v18 = vadd.f32 %v688_v16, %v612_v41 }
 0x1c7   : > { %599 = vst.msk [vmem:[%s1375_s26 + $0x18] sm:$0xf] %vm592_vm2, %v590_v14  ;;  %s1131_s26 = scalar_lea.hbm %s1710_s4, 64 }
 0x1c8   : > { %718 = vst.msk [vmem:[%s1377_s10 + $0x14] sm:$0xf] %vm592_vm2, %v710_v17  ;;  %p1133_p10 = scmp.lt.s32.totalorder %s1131_s26, %s1127_s11 }
 0x1c9   : > { %716 = vst.msk [vmem:[%s1377_s10 + $0xc] sm:$0xf] %vm592_vm2, %v708_v18 }
 0x1ca   : > { %p1134_p13 = por %p1133_p10, %p1132_p8 }
 0x1cc   : > { %p1135_p0 = pnand %p1134_p13, %p1130_p7 }
 0x1ce   : > { %1138 = shalt.err (!%p1135_p0)
}
 0x1cf   : > { %s1236_s12 = smov 64   ;;  %s1237_s13 = smov 4   ;;  %v684_v42 = vpop.permute.xlu1 %683  ;;  %v694_v47 = vpop.permute.xlu0 %693  ;;  %v613_v20 = vmul.f32 %v1466_v45, %v1595_v60  ;;  %v616_v23 = vmul.f32 %v1477_v48, %v438_v34 }
 0x1d0   : > { %976 = dma.vmem_to_hbm [thread:$0]  (%p1319_p9), %s742_s17, 512, %s744_s25, %s722_s9, %s1236_s12, %s1236_s12, %s1237_s13   ;;  %v706_v44 = vadd.f32 %v684_v42, %v610_v38  ;;  %v711_v19 = vadd.f32 %v694_v47, %v615_v43 }
 0x1d1   : > { %s759_s16 = scalar_lea.hbm %s1711_s5, %s970_s14  ;;  %s760_s17 = sshll.u32 %s1377_s10, 4  ;;  %s761_s17 = int_to_ptr.vmem [resolvable:$true] %s760_s17 }
 0x1d2   : > { %714 = vst.msk [vmem:[%s1377_s10 + $0x4] sm:$0xf] %vm592_vm2, %v706_v44  ;;  %s762_s25 = sshll.u32 %s759_s16, 4  ;;  %s727_s9 = scalar_lea.sflag [#allocation11], %s1358_s22  ;;  %s763_s25 = int_to_ptr.hbm [resolvable:$true] %s762_s25 }
 0x1d3   : > { %719 = vst.msk [vmem:[%s1377_s10 + $0x18] sm:$0xf] %vm592_vm2, %v711_v19  ;;  %s1153_s2 = sshra.s32 %s763_s25, 4  ;;  %s1159_s24 = scalar_lea.hbm %s1711_s5, 64  ;;  %s1154_s2 = int_to_ptr.hbm [resolvable:$true] %s1153_s2 }
 0x1d4   : > { %s1155_s11 = scalar_lea.hbm %s1154_s2, 32  ;;  %p1160_p4 = scmp.lt.s32.totalorder %s1154_s2, %s1711_s5 }
 0x1d5   : > { %p1156_p1 = scmp.ne.s32.totalorder %s1154_s2, %s1155_s11  ;;  %p1161_p5 = scmp.lt.s32.totalorder %s1159_s24, %s1155_s11 }
 0x1d7   : > { %v690_v21 = vpop.permute.xlu1 %689  ;;  %p1157_p2 = pnand %p1156_p1, %p1319_p9  ;;  %p1162_p6 = por %p1161_p5, %p1160_p4 }
 0x1d8   : > { %v709_v22 = vadd.f32 %v690_v21, %v613_v20 }
 0x1d9   : > { %p1158_p3 = pneg %p1157_p2 }
 0x1da   : > { %717 = vst.msk [vmem:[%s1377_s10 + $0x10] sm:$0xf] %vm592_vm2, %v709_v22 }
 0x1db   : > { %p1163_p7 = pnand %p1162_p6, %p1158_p3 }
 0x1df   : > { %v696_v25 = vpop.permute.xlu1 %695 }
 0x1e0   : > { %v712_v26 = vadd.f32 %v696_v25, %v616_v23 }
 0x1e2   : > { %720 = vst.msk [vmem:[%s1377_s10 + $0x1c] sm:$0xf] %vm592_vm2, %v712_v26 }
 0x1e3   : > { %1166 = shalt.err (!%p1163_p7)
}
 0x1e4   : > { %977 = dma.vmem_to_hbm [thread:$0]  (%p1319_p9), %s761_s17, 512, %s763_s25, %s727_s9, %s1236_s12, %s1236_s12, %s1237_s13  }
 0x1e5 PF: > { %s777_s22 = sand.u32 1, %s1209_s18   ;;  %p988_p8 = pnand %p947_p12, %p1326_p11 }
 0x1e6   : > { %s778_s10 = scalar_lea.sflag [#allocation6], %s777_s22 }
 0x1e7   : > { %p989_p10 = pneg %p988_p8 }
 0x1e9   : > { %1200 = dma.done.wait (%p989_p10), %s778_s10, 512  }
 0x1ea   : > { %1202 = vsyncadd (%p989_p10), %s778_s10, 4294966784  ;;  %s788_s27 = scalar_lea.sflag [#allocation11], %s777_s22 }
 0x1eb   : > { %1204 = dma.done.wait (%p989_p10), %s788_s27, 512  }
 0x1ec   : > { %1206 = vsyncadd (%p989_p10), %s788_s27, 4294966784  ;;  %s28_s23 = sadd.s32 1, %s1229_s23   ;;  %s1723_s21 = sld [smem:[#allocation16_spill]] }
 0x1ed   : > { %p25_p13 = scmp.ge.s32.totalorder %s28_s23, 4   ;;  %s1724_s22 = sld [smem:[#allocation17_spill]] }
 0x1ee   : > { %s1725_s18 = smov %s1213_s19  ;;  %s1726_s19 = smov %s1217_s20 }
 0x1ef   : > { %s1727_s20 = smov %s1324_s7  ;;  %27 = sbr.rel (!%p25_p13) target bundleno = 12 (0xc), region = 121 }
 0x1f4   :  { %794 = vsyncpa [#allocation5], 1 }
 0x1f5   :  { %796 = vsyncpa [#allocation5 + $0x1], 1 }
 0x1f6   :  { %797 = vsyncpa [#allocation8], 1 }
 0x1f7   :  { %799 = vsyncpa [#allocation8 + $0x1], 1 }
 0x1f8   :  { %800 = vsyncpa [#allocation6], 1 }
 0x1f9   :  { %802 = vsyncpa [#allocation6 + $0x1], 1 }
 0x1fa   :  { %803 = vsyncpa [#allocation11], 1 }
 0x1fb   :  { %805 = vsyncpa [#allocation11 + $0x1], 1 }

</bundles_post_ra>
